<compile_context>
chip_gen: v6e
topology: v6e:2x2x1
jax: 0.10.0
libtpu: 0.0.40
codegen_flags: <defaults>
</compile_context>

<pallas_src>
import functools
import math

import jax
import jax.numpy as jnp
from jax import lax
from jax.experimental import pallas as pl
from jax.experimental.pallas import tpu as pltpu


def _gp_ssq_kernel(g_ref, ssq_ref, *, r_total, block_r, n_ilp=4):
    """Grid step (sample i, row-tile j): accumulate the per-sample partial
    sum-of-squares of the gradient into the resident (1, 8, 128) f32 output."""
    j = pl.program_id(1)
    last_j = pl.num_programs(1) - 1

    @pl.when(j == 0)
    def _init():
        ssq_ref[...] = jnp.zeros_like(ssq_ref)

    def _accumulate(mask_rows):
        # Native-dtype DMA; f32 cast on the VPU (hidden under the tile DMA).
        g = g_ref[0].astype(jnp.float32)                     # (block_r, 128)
        if mask_rows:
            # Zero garbage rows of the partial trailing block before squaring
            # so stale VMEM NaN/Inf cannot leak into the accumulator.
            row = j * block_r + lax.broadcasted_iota(jnp.int32, g.shape, 0)
            g = jnp.where(row < r_total, g, 0.0)
        sq = g * g

        # Fold block_r rows down to one (8, 128) partial per sample using up
        # to n_ilp independent accumulators (ILP across the 4 VALU slots),
        # then a pairwise combine; the single cross-lane reduce is deferred to
        # the wrapper epilogue.
        ngroups = block_r // 8
        nchunks = min(n_ilp, ngroups)
        parts = []
        base = 0
        for c in range(nchunks):
            gc = ngroups // nchunks + (1 if c < ngroups % nchunks else 0)
            seg = sq[base * 8:(base + gc) * 8, :]
            if gc > 1:
                seg = jnp.sum(seg.reshape(gc, 8, 128), axis=0)
            parts.append(seg)
            base += gc
        while len(parts) > 1:
            nxt = [parts[a] + parts[a + 1] for a in range(0, len(parts) - 1, 2)]
            if len(parts) % 2:
                nxt.append(parts[-1])
            parts = nxt

        ssq_ref[...] = ssq_ref[...] + parts[0][None, :, :]

    if r_total % block_r != 0:
        # Only the last row tile needs the mask; interior tiles stay unmasked.
        @pl.when(j == last_j)
        def _tail():
            _accumulate(True)

        @pl.when(j != last_j)
        def _body():
            _accumulate(False)
    else:
        _accumulate(False)


def gradient_penalty_from_grad(grad_interp, *, target_block_bytes=4 << 20):
    """((||grad_interp.view(N,-1)||_2 - 1)^2).mean() with a Pallas reduction."""
    n = grad_interp.shape[0]
    d = math.prod(grad_interp.shape[1:])
    g2 = grad_interp.reshape(n, d)                 # contiguous reshape, no copy

    # Lane-pad the flat feature axis to a multiple of 128 and guarantee at
    # least 8 rows of 128 lanes; this only copies when d is ragged or tiny
    # (common conv feature sizes with d % 1024 == 0 need no pad at all).
    d_pad = max(pl.cdiv(d, 128) * 128, 8 * 128)
    if d_pad != d:
        g2 = jnp.pad(g2, ((0, 0), (0, d_pad - d)))
    r_total = d_pad // 128
    g3 = g2.reshape(n, r_total, 128)               # sublane/lane-dense view

    # Byte-budgeted row tile: ~4 MiB per input buffer (double-buffered by the
    # BlockSpec pipeline) regardless of n or dtype -> safe under the scoped
    # VMEM default on v5e/v6e/v7x while amortizing per-step overhead.
    itemsize = jnp.dtype(g3.dtype).itemsize
    budget_rows = max(8, (int(target_block_bytes) // (128 * itemsize)) // 8 * 8)
    block_r = min(budget_rows, (r_total // 8) * 8)  # multiple of 8, <= r_total
    grid_r = pl.cdiv(r_total, block_r)

    block_bytes = block_r * 128 * itemsize
    vmem_limit = int(min(max(2 * block_bytes + (4 << 20), 32 << 20), 48 << 20))

    kernel = functools.partial(_gp_ssq_kernel, r_total=r_total, block_r=block_r)

    ssq_part = pl.pallas_call(
        kernel,
        out_shape=jax.ShapeDtypeStruct((n, 8, 128), jnp.float32),
        grid=(n, grid_r),
        in_specs=[pl.BlockSpec((1, block_r, 128), lambda i, j: (i, j, 0))],
        out_specs=pl.BlockSpec((1, 8, 128), lambda i, j: (i, 0, 0)),
        compiler_params=pltpu.CompilerParams(
            dimension_semantics=("parallel", "arbitrary"),
            vmem_limit_bytes=vmem_limit),
    )(g3)

    # Tiny epilogue on n*1024 floats: cross-lane reduce, sqrt, penalty, mean.
    ssq = jnp.sum(ssq_part, axis=(1, 2))           # (n,)
    norm = jnp.sqrt(ssq)
    return jnp.mean((norm - 1.0) ** 2)


def gradient_penalty_loss(interp, critic_fn, *, target_block_bytes=4 << 20):
    """Forward of GradientPenaltyLoss.

    interp: interpolated samples (N, C, H, W); critic_fn(interp) -> interp_crit.
    """
    # TODO(synk): torch.autograd.grad of an arbitrary external critic graph has
    # no in-kernel Pallas equivalent; the VJP (grad_outputs = ones) is taken
    # with jax.vjp here and only the norm-penalty reduction runs in Pallas.
    interp_crit, vjp_fn = jax.vjp(critic_fn, interp)
    (grad_interp,) = vjp_fn(jnp.ones_like(interp_crit))
    return gradient_penalty_from_grad(
        grad_interp, target_block_bytes=target_block_bytes)


def _gp_ref(grad_interp):
    """Pure-JAX reference mirroring the PyTorch penalty math."""
    g = grad_interp.reshape(grad_interp.shape[0], -1).astype(jnp.float32)
    norm = jnp.sqrt(jnp.sum(g * g, axis=1))
    return jnp.mean((norm - 1.0) ** 2)


if __name__ == "__main__":
    key = jax.random.PRNGKey(0)
    k1, k2, k3, k4, k5, k6 = jax.random.split(key, 6)

    # --- Test 1: NCHW interp, D = 4*16*16 = 1024 (no pad, single row tile) ---
    B, C, H, W = 2, 4, 16, 16
    interp = jax.random.normal(k1, (B, C, H, W), jnp.float32)
    w = jax.random.normal(k2, (C,), jnp.float32) * 0.5
    bias = jax.random.normal(k3, (), jnp.float32) * 0.1

    def critic(x):
        # Small smooth stand-in critic: interp_crit has shape (N, H, W).
        return jnp.tanh(jnp.einsum("nchw,c->nhw", x, w) + bias)

    loss = gradient_penalty_loss(interp, critic)
    loss = jax.block_until_ready(loss)

    crit, vjp_fn = jax.vjp(critic, interp)
    (grad_interp,) = vjp_fn(jnp.ones_like(crit))
    ref = _gp_ref(grad_interp)
    assert jnp.allclose(loss, ref, rtol=1e-5, atol=1e-5), (loss, ref)

    # --- Test 2: ragged D = 3*10*13 = 390 — exercises the wrapper zero-pad ---
    B2, C2, H2, W2 = 2, 3, 10, 13
    interp2 = jax.random.normal(k4, (B2, C2, H2, W2), jnp.float32)
    w2 = jnp.linspace(-1.0, 1.0, C2, dtype=jnp.float32)

    def critic2(x):
        return jnp.tanh(jnp.einsum("nchw,c->nhw", x, w2))

    loss2 = gradient_penalty_loss(interp2, critic2)
    loss2 = jax.block_until_ready(loss2)

    crit2, vjp2 = jax.vjp(critic2, interp2)
    (g2,) = vjp2(jnp.ones_like(crit2))
    ref2 = _gp_ref(g2)
    assert jnp.allclose(loss2, ref2, rtol=1e-5, atol=1e-5), (loss2, ref2)

    # --- Test 3: D = 10*16*16 = 2560 -> R = 20 rows, block_r = 16, partial
    # trailing row tile — exercises the in-kernel last-tile row mask. ---------
    grad3 = jax.random.normal(k5, (2, 10, 16, 16), jnp.float32) * 0.3
    loss3 = jax.block_until_ready(gradient_penalty_from_grad(grad3))
    ref3 = _gp_ref(grad3)
    assert jnp.allclose(loss3, ref3, rtol=1e-5, atol=1e-5), (loss3, ref3)

    # --- Test 4: bf16 gradient, D = 8*16*16 = 2048 — exercises the native-
    # dtype DMA + in-kernel f32 upcast. --------------------------------------
    grad4 = (jax.random.normal(k6, (2, 8, 16, 16), jnp.float32) * 0.2
             ).astype(jnp.bfloat16)
    loss4 = jax.block_until_ready(gradient_penalty_from_grad(grad4))
    ref4 = _gp_ref(grad4)
    assert jnp.allclose(loss4, ref4, rtol=1e-4, atol=1e-4), (loss4, ref4)

    print("KERNEL_OK")
</pallas_src>

<mosaic_0001>
module attributes {stable_mosaic.version = 11 : i64} {
  func.func @_gp_ssq_kernel(%arg0: i32, %arg1: i32, %arg2: memref<1x8x128xf32, #tpu.memory_space<vmem>>, %arg3: memref<1x8x128xf32, #tpu.memory_space<vmem>>) attributes {dimension_semantics = [#tpu.dimension_semantics<parallel>, #tpu.dimension_semantics<arbitrary>], iteration_bounds = array<i64: 2, 1>, scalar_prefetch = 0 : i64, scratch_operands = 0 : i64, tpu.core_type = #tpu.core_type<tc>, window_params = [{transform_indices = @transform_0, window_bounds = array<i64: 1, 8, 128>}, {transform_indices = @transform_1, window_bounds = array<i64: 1, 8, 128>}]} {
    %c0_i32 = arith.constant 0 : i32
    %0 = arith.cmpi eq, %arg1, %c0_i32 : i32
    %1 = arith.extui %0 : i1 to i32
    %c0_i32_0 = arith.constant 0 : i32
    %2 = arith.cmpi ne, %1, %c0_i32_0 : i32
    scf.if %2 {
      %cst = arith.constant 0.000000e+00 : f32
      %10 = vector.broadcast %cst : f32 to vector<1x8x128xf32>
      %c0_9 = arith.constant 0 : index
      %c0_10 = arith.constant 0 : index
      %c0_11 = arith.constant 0 : index
      %11 = vector.load %arg3[%c0_9, %c0_10, %c0_11] : memref<1x8x128xf32, #tpu.memory_space<vmem>>, vector<1x8x128xf32>
      tpu.vector_store %arg3[%c0_9, %c0_10, %c0_11], %10 {strides = array<i32>} : memref<1x8x128xf32, #tpu.memory_space<vmem>>, vector<1x8x128xf32>,
    } else {
    }
    %c0 = arith.constant 0 : index
    %c0_1 = arith.constant 0 : index
    %c0_2 = arith.constant 0 : index
    %3 = vector.load %arg2[%c0, %c0_1, %c0_2] : memref<1x8x128xf32, #tpu.memory_space<vmem>>, vector<1x8x128xf32>
    %4 = vector.shape_cast %3 : vector<1x8x128xf32> to vector<8x128xf32>
    %5 = arith.mulf %4, %4 : vector<8x128xf32>
    %c0_3 = arith.constant 0 : index
    %c0_4 = arith.constant 0 : index
    %c0_5 = arith.constant 0 : index
    %6 = vector.load %arg3[%c0_3, %c0_4, %c0_5] : memref<1x8x128xf32, #tpu.memory_space<vmem>>, vector<1x8x128xf32>
    %7 = vector.shape_cast %5 : vector<8x128xf32> to vector<1x8x128xf32>
    %8 = arith.addf %6, %7 : vector<1x8x128xf32>
    %c0_6 = arith.constant 0 : index
    %c0_7 = arith.constant 0 : index
    %c0_8 = arith.constant 0 : index
    %9 = vector.load %arg3[%c0_6, %c0_7, %c0_8] : memref<1x8x128xf32, #tpu.memory_space<vmem>>, vector<1x8x128xf32>
    tpu.vector_store %arg3[%c0_6, %c0_7, %c0_8], %8 {strides = array<i32>} : memref<1x8x128xf32, #tpu.memory_space<vmem>>, vector<1x8x128xf32>,
    return
  }
  func.func @transform_0(%arg0: i32, %arg1: i32) -> (i32, i32, i32) {
    %c0_i32 = arith.constant 0 : i32
    %c0_i32_0 = arith.constant 0 : i32
    return %arg0, %arg1, %c0_i32 : i32, i32, i32
  }
  func.func @transform_1(%arg0: i32, %arg1: i32) -> (i32, i32, i32) {
    %c0_i32 = arith.constant 0 : i32
    %c0_i32_0 = arith.constant 0 : i32
    %c0_i32_1 = arith.constant 0 : i32
    return %arg0, %c0_i32, %c0_i32_0 : i32, i32, i32
  }
}

</mosaic_0001>

<bundles_post_ra>
// kernel: tpu_custom_call.1
= control target key start
LH: loop header
LB: loop body
LE: loop exit
PB: predicated region body
PF: predicated region fallthrough
CT: control target
= control target key end

     0   :  { %6 = vsyncpa [#allocation3], 0  ;;  %s582_s0 = inlined_call_operand.hbm [shape: f32[2,8,128], index: 0, kind: input, shape index: {}]   ;;  %s583_s1 = inlined_call_operand.hbm [shape: f32[2,8,128], index: 1, kind: output, shape index: {}]  }
   0x1   :  { %8 = vsyncpa [#allocation3 + $0x1], 0 }
   0x2   :  { %9 = vsyncpa [#allocation4], 0 }
   0x3   :  { %11 = vsyncpa [#allocation4 + $0x1], 0  ;;  %s448_s6 = smov 0   ;;  %s450_s7 = smov 0  }
   0x4   :  { %s452_s8 = smov 0   ;;  %s454_s9 = smov 0  }
   0x5   :  { %s456_s10 = smov 0   ;;  %s458_s11 = smov 0  }
   0x6 LB: > { %s250_s12 = sadd.s32 4294967295, %s434_s11   ;;  %s251_s13 = sadd.s32 4294967294, %s434_s11   ;;  %s434_s11 = sphi %s458_s11, %s17_s11   ;;  %s430_s10 = sphi %s456_s10, %s595_s10   ;;  %s426_s9 = sphi %s454_s9, %s594_s9   ;;  %s422_s8 = sphi %s452_s8, %s593_s8   ;;  %s418_s7 = sphi %s450_s7, %s592_s7   ;;  %s414_s6 = sphi %s448_s6, %s591_s6  }
   0x7   : > { %s29_s14 = sadd.s32 1, %s430_s10  ;;  %s38_s15 = sadd.s32 1, %s422_s8 }
   0x8   : > { %p31_p0 = scmp.ge.s32.totalorder %s29_s14, 2  ;;  %p45_p1 = scmp.ne.s32.totalorder %s422_s8, %s418_s7 }
   0x9   : > { %p46_p2 = scmp.eq.s32.totalorder %s434_s11, 0  ;;  %p51_p3 = scmp.ne.s32.totalorder %s418_s7, %s414_s6 }
   0xa   : > { %s597_s14 = smov (%p31_p0, %s29_s14), 0  ;;  %p52_p5 = scmp.eq.s32.totalorder %s250_s12, 0 }
   0xb   : > { %p489_p4 = por %p46_p2, %p45_p1  ;;  %s33_s17 = ssub.s32 %s430_s10, %s597_s14 }
   0xc   : > { %p75_p6 = scmp.eq.s32.totalorder %s250_s12, 1  ;;  %p36_p7 = scmp.eq.s32.totalorder %s33_s17, 0 }
   0xd   : > { %p495_p8 = por %p52_p5, %p51_p3  ;;  %p81_p10 = scmp.eq.s32.totalorder %s251_s13, 1 }
   0xe   : > { %p499_p9 = por %p75_p6, %p45_p1  ;;  %p275_p13 = scmp.lt.s32.totalorder %s434_s11, 2 }
   0xf   : > { %s504_s20 = scalar_select %p36_p7, %s422_s8, %s38_s15  }
  0x10   : > { %p506_p11 = por %p81_p10, %p51_p3  ;;  %s101_s22 = sand.u32 1, %s422_s8  }
  0x11   : > { %s254_s23 = sshll.u32 %s101_s22, 3  ;;  %s255_s24 = sshll.u32 %s430_s10, 7 }
  0x12   : > { %s587_s21 = scalar_select %p506_p11, 1, 0 }
  0x13   : > { %s111_s27 = scalar_lea.hbm %s582_s0, %s255_s24  ;;  %s105_s28 = scalar_lea.vmem [#allocation2], %s254_s23 }
  0x14   : > { %s113_s29 = sshll.u32 %s105_s28, 4  ;;  %p519_p0 = pnand %p275_p13, %p489_p4  ;;  %s114_s29 = int_to_ptr.vmem [resolvable:$true] %s113_s29 }
  0x15   : > { %p256_p1 = scmp.ge.s32.totalorder %s434_s11, 1  ;;  %p118_p2 = scmp.lt.s32.totalorder %s434_s11, 3 }
  0x16   : > { %s102_s2 = scalar_lea.sflag [#allocation3], %s101_s22  ;;  %p328_p3 = pneg %p519_p0 }
  0x17   : > { %s339_s3 = scalar_lea.vmem %s114_s29, 128  ;;  %s436_s4 = smov [#allocation2]  }
  0x18   : > { %p340_p5 = scmp.ne.s32.totalorder %s114_s29, %s339_s3  ;;  %s344_s5 = sshll.u32 %s436_s4, 4  ;;  %s345_s5 = int_to_ptr.vmem [resolvable:$false] %s344_s5 }
  0x19   : > { %s346_s12 = scalar_lea.vmem %s345_s5, 256  ;;  %p347_p10 = scmp.lt.s32.totalorder %s114_s29, %s345_s5 }
  0x1a   : > { %p342_p6 = pnand %p340_p5, %p328_p3  ;;  %p348_p12 = scmp.lt.s32.totalorder %s346_s12, %s339_s3 }
  0x1c   : > { %p343_p7 = pneg %p342_p6  ;;  %p349_p4 = por %p348_p12, %p347_p10 }
  0x1e   : > { %p350_p13 = pnand %p349_p4, %p343_p7 }
  0x20   : > { %353 = shalt.err (!%p350_p13)
}
  0x21   : > { %270 = dma.hbm_to_vmem [thread:$0]  (!%p519_p0), %s111_s27, 128, %s114_s29, %s102_s2  }
  0x22   : > { %p119_p11 = pnand %p256_p1, %p118_p2 }
  0x23   : > { %s534_s13 = sand.u32 (!%p119_p11), 1, %s418_s7  }
  0x24   : > { %122 = sbr.rel (%p119_p11) target bundleno = 66 (0x42), region = 24  ;;  %s257_s15 = sshll.u32 (!%p119_p11), %s534_s13, 3 }
  0x25   : > { %s125_s16 = scalar_lea.sflag (!%p119_p11), [#allocation3], %s534_s13  ;;  %s128_s17 = scalar_lea.vmem (!%p119_p11), [#allocation2], %s257_s15 }
  0x29   : > { %405 = dma.done.wait (%p495_p8), %s125_s16, 128  }
  0x2a   : > { %407 = vsyncadd (%p495_p8), %s125_s16, 4294967168  ;;  %v152_v0 = vld [vmem:[%s128_s17] sm:$0xff]  ;;  %s260_s22 = sshll.u32 %s426_s9, 7  ;;  %s146_s23 = scalar_lea.vmem [#allocation5], %s257_s15 }
  0x2b   : > { %s171_s24 = sshll.u32 %s146_s23, 4  ;;  %v153_v1 = vmul.f32 %v152_v0, %v152_v0  ;;  %s169_s27 = scalar_lea.hbm %s583_s1, %s260_s22  ;;  %s172_s24 = int_to_ptr.vmem [resolvable:$true] %s171_s24 }
  0x2c   : > { %s158_s28 = scalar_lea.sflag [#allocation4], %s534_s13  ;;  %s354_s29 = scalar_lea.vmem %s172_s24, 128 }
  0x2d   : > { %156 = vst [vmem:[%s146_s23] sm:$0xff] %v153_v1  ;;  %p355_p11 = scmp.ne.s32.totalorder %s172_s24, %s354_s29  ;;  %s437_s18 = smov [#allocation5]  }
  0x2e   : > { %s358_s30 = sshll.u32 %s437_s18, 4  ;;  %s359_s30 = int_to_ptr.vmem [resolvable:$false] %s358_s30 }
  0x2f   : > { %p356_p12 = pnand %p355_p11, %p499_p9  ;;  %s360_s2 = scalar_lea.vmem %s359_s30, 256 }
  0x30   : > { %p361_p0 = scmp.lt.s32.totalorder %s172_s24, %s359_s30  ;;  %p362_p1 = scmp.lt.s32.totalorder %s360_s2, %s354_s29 }
  0x31   : > { %p357_p8 = pneg %p356_p12 }
  0x32   : > { %p363_p2 = por %p362_p1, %p361_p0 }
  0x34   : > { %p364_p3 = pnand %p363_p2, %p357_p8 }
  0x36   : > { %367 = shalt.err (!%p364_p3)
}
  0x37   : > { %s368_s9 = scalar_lea.hbm %s169_s27, 128  ;;  %s372_s5 = scalar_lea.hbm %s583_s1, 256 }
  0x38   : > { %p369_p5 = scmp.ne.s32.totalorder %s169_s27, %s368_s9  ;;  %p373_p10 = scmp.lt.s32.totalorder %s169_s27, %s583_s1 }
  0x39   : > { %p374_p4 = scmp.lt.s32.totalorder %s372_s5, %s368_s9 }
  0x3a   : > { %p370_p6 = pnand %p369_p5, %p499_p9 }
  0x3b   : > { %p375_p13 = por %p374_p4, %p373_p10 }
  0x3c   : > { %p371_p7 = pneg %p370_p6 }
  0x3e   : > { %p376_p11 = pnand %p375_p13, %p371_p7 }
  0x40   : > { %379 = shalt.err (!%p376_p11)
}
  0x41   : > { %265 = dma.vmem_to_hbm [thread:$0]  (%p499_p9), %s172_s24, 128, %s169_s27, %s158_s28  }
  0x42 PF: > { %s183_s15 = sand.u32 1, %s414_s6   ;;  %p589_p12 = scmp.ne.s32.totalorder %s587_s21, 0 }
  0x43   : > { %p590_p8 = scmp.ge.s32.totalorder %s434_s11, 2  ;;  %s184_s16 = scalar_lea.sflag [#allocation4], %s183_s15 }
  0x45   : > { %p272_p0 = pnand %p590_p8, %p589_p12 }
  0x47   : > { %p273_p1 = pneg %p272_p0 }
  0x49   : > { %409 = dma.done.wait (%p273_p1), %s184_s16, 128  }
  0x4a   : > { %411 = vsyncadd (%p273_p1), %s184_s16, 4294967168  ;;  %s17_s11 = sadd.s32 1, %s434_s11   ;;  %s591_s6 = smov %s418_s7 }
  0x4b   : > { %p14_p2 = scmp.ge.s32.totalorder %s17_s11, 4   ;;  %s592_s7 = smov %s422_s8 }
  0x4c   : > { %s593_s8 = smov %s504_s20  ;;  %s594_s9 = smov %s430_s10 }
  0x4d   : > { %s595_s10 = smov %s597_s14  ;;  %16 = sbr.rel (!%p14_p2) target bundleno = 6 (0x6), region = 73 }
  0x52   :  { %189 = vsyncpa [#allocation3], 1 }
  0x53   :  { %191 = vsyncpa [#allocation3 + $0x1], 1 }
  0x54   :  { %192 = vsyncpa [#allocation4], 1 }
  0x55   :  { %194 = vsyncpa [#allocation4 + $0x1], 1 }

</bundles_post_ra>
